<compile_context>
chip_gen: v7x
topology: tpu7x:2x2x1
jax: 0.10.0
libtpu: 0.0.40
codegen_flags: <defaults>
</compile_context>

<pallas_src>
import math
from functools import partial

import jax
import jax.numpy as jnp
from jax import lax
from jax.experimental import pallas as pl
from jax.experimental.pallas import tpu as pltpu

SQRT2 = math.sqrt(2.0)

_LANE = 128  # lane quantum (last dim)
_SUB = 8     # sublane quantum for f32 (second-to-last dim)


def _round_up(n, m):
    return ((n + m - 1) // m) * m


def _fused_simplenet_kernel(x_ref, w0_ref, wh_ref, wf_ref, o_ref, h_ref, *, n_hidden):
    """Whole network on one batch tile; activation lives in VMEM scratch h_ref."""
    # initial layer + relu * sqrt(2)
    h = jnp.dot(x_ref[...], w0_ref[...], preferred_element_type=jnp.float32)
    h_ref[...] = jnp.maximum(h, 0.0) * SQRT2

    # hidden layers (stacked weights), activation resident in VMEM scratch
    def body(l, carry):
        y = jnp.dot(h_ref[...], wh_ref[l], preferred_element_type=jnp.float32)
        h_ref[...] = jnp.maximum(y, 0.0) * SQRT2
        return carry

    lax.fori_loop(0, n_hidden, body, 0, unroll=True)

    # final layer, no activation; output is lane-dense (Dout padded to 128)
    o_ref[...] = jnp.dot(
        h_ref[...], wf_ref[...], preferred_element_type=jnp.float32
    ).astype(o_ref.dtype)


def init_simplenet_params(key, depth, width, in_dim=784):
    """Deterministic init mirroring the nn.Linear shapes (stored as (in, out))."""
    keys = jax.random.split(key, depth)
    params = []
    # initial: Linear(784, width, bias=False)
    params.append(
        jax.random.normal(keys[0], (in_dim, width), jnp.float32) / math.sqrt(in_dim)
    )
    # hidden: (depth - 2) x Linear(width, width, bias=False)
    for i in range(depth - 2):
        params.append(
            jax.random.normal(keys[1 + i], (width, width), jnp.float32)
            / math.sqrt(width)
        )
    # final: Linear(width, 1, bias=False)
    params.append(
        jax.random.normal(keys[depth - 1], (width, 1), jnp.float32) / math.sqrt(width)
    )
    return params


@jax.jit
def simplenet_forward(x, params):
    w0 = params[0]            # (in_dim, width)
    wh_list = params[1:-1]    # each (width, width)
    wf = params[-1]           # (width, 1)

    B, in_dim = x.shape
    width = w0.shape[1]
    n_hidden = len(wh_list)

    # Pad to TPU tile quanta: sublanes (8) on batch, lanes (128) on every feature dim.
    B_pad = _round_up(max(B, _SUB), _SUB)
    TILE_B = min(B_pad, 256)
    B_pad = _round_up(B_pad, TILE_B)
    in_pad = _round_up(in_dim, _LANE)
    w_pad = _round_up(max(width, _LANE), _LANE)
    out_pad = _LANE  # lane-dense final output (Dout=1 -> 128), sliced after the kernel

    xp = jnp.zeros((B_pad, in_pad), jnp.float32).at[:B, :in_dim].set(x)
    w0p = jnp.zeros((in_pad, w_pad), jnp.float32).at[:in_dim, :width].set(w0)
    if n_hidden > 0:
        wh = jnp.stack(wh_list)  # (n_hidden, width, width)
        whp = (
            jnp.zeros((n_hidden, w_pad, w_pad), jnp.float32)
            .at[:, :width, :width]
            .set(wh)
        )
    else:
        # dummy (never read: fori_loop runs 0 iterations)
        whp = jnp.zeros((1, w_pad, w_pad), jnp.float32)
    wfp = jnp.zeros((w_pad, out_pad), jnp.float32).at[:width, :1].set(wf)

    grid = (B_pad // TILE_B,)

    out_padded = pl.pallas_call(
        partial(_fused_simplenet_kernel, n_hidden=n_hidden),
        out_shape=jax.ShapeDtypeStruct((B_pad, out_pad), jnp.float32),
        grid_spec=pltpu.PrefetchScalarGridSpec(
            num_scalar_prefetch=0,
            grid=grid,
            in_specs=[
                # per-batch-tile activations
                pl.BlockSpec((TILE_B, in_pad), lambda b: (b, 0)),
                # weights: same block every grid step -> stay resident in VMEM
                pl.BlockSpec((in_pad, w_pad), lambda b: (0, 0)),
                pl.BlockSpec((whp.shape[0], w_pad, w_pad), lambda b: (0, 0, 0)),
                pl.BlockSpec((w_pad, out_pad), lambda b: (0, 0)),
            ],
            out_specs=pl.BlockSpec((TILE_B, out_pad), lambda b: (b, 0)),
            scratch_shapes=[pltpu.VMEM((TILE_B, w_pad), jnp.float32)],
        ),
        compiler_params=pltpu.CompilerParams(
            # batch tiles are independent -> megacore sharding on v7x
            dimension_semantics=("parallel",),
        ),
    )(xp, w0p, whp, wfp)

    return out_padded[:B, :1]


def simplenet_reference(x, params):
    h = jnp.maximum(x @ params[0], 0.0) * SQRT2
    for w in params[1:-1]:
        h = jnp.maximum(h @ w, 0.0) * SQRT2
    return h @ params[-1]


if __name__ == "__main__":
    depth, width, batch, in_dim = 4, 32, 2, 784

    key = jax.random.PRNGKey(0)
    kx, kp = jax.random.split(key)
    x = jax.random.normal(kx, (batch, in_dim), jnp.float32)
    params = init_simplenet_params(kp, depth, width, in_dim)

    out = simplenet_forward(x, params)
    out = jax.block_until_ready(out)

    ref = simplenet_reference(x, params)
    assert out.shape == (batch, 1), out.shape
    assert jnp.allclose(out, ref, atol=1e-4, rtol=1e-4), (out, ref)

    print("KERNEL_OK")
</pallas_src>

<mosaic_0001>
module attributes {stable_mosaic.version = 11 : i64} {
  func.func @_fused_simplenet_kernel(%arg0: i32, %arg1: memref<8x896xf32, #tpu.memory_space<vmem>>, %arg2: memref<896x128xf32, #tpu.memory_space<vmem>>, %arg3: memref<2x128x128xf32, #tpu.memory_space<vmem>>, %arg4: memref<128x128xf32, #tpu.memory_space<vmem>>, %arg5: memref<8x128xf32, #tpu.memory_space<vmem>>, %arg6: memref<8x128xf32, #tpu.memory_space<vmem>>) attributes {dimension_semantics = [#tpu.dimension_semantics<parallel>], iteration_bounds = array<i64: 1>, scalar_prefetch = 0 : i64, scratch_operands = 1 : i64, tpu.core_type = #tpu.core_type<tc>, window_params = [{transform_indices = @transform_0, window_bounds = array<i64: 8, 896>}, {pipeline_mode = #tpu.pipeline_mode<synchronous>, transform_indices = @transform_1, window_bounds = array<i64: 896, 128>}, {pipeline_mode = #tpu.pipeline_mode<synchronous>, transform_indices = @transform_2, window_bounds = array<i64: 2, 128, 128>}, {pipeline_mode = #tpu.pipeline_mode<synchronous>, transform_indices = @transform_3, window_bounds = array<i64: 128, 128>}, {transform_indices = @transform_4, window_bounds = array<i64: 8, 128>}]} {
    %c0 = arith.constant 0 : index
    %c0_0 = arith.constant 0 : index
    %0 = vector.load %arg1[%c0, %c0_0] : memref<8x896xf32, #tpu.memory_space<vmem>>, vector<8x896xf32>
    %c0_1 = arith.constant 0 : index
    %c0_2 = arith.constant 0 : index
    %1 = vector.load %arg2[%c0_1, %c0_2] : memref<896x128xf32, #tpu.memory_space<vmem>>, vector<896x128xf32>
    %cst = arith.constant dense<0.000000e+00> : vector<8x128xf32>
    %2 = tpu.matmul %0, %1, %cst {dimension_numbers = #tpu.dot_dimension_numbers<[1], [0], [0], [1], [0, 0, 1, 1], [], []>} : vector<8x896xf32>, vector<896x128xf32>, vector<8x128xf32> -> vector<8x128xf32>
    %cst_3 = arith.constant 0.000000e+00 : f32
    %3 = vector.broadcast %cst_3 : f32 to vector<8x128xf32>
    %4 = arith.maximumf %2, %3 : vector<8x128xf32>
    %cst_4 = arith.constant 1.41421354 : f32
    %5 = vector.broadcast %cst_4 : f32 to vector<8x128xf32>
    %6 = arith.mulf %4, %5 : vector<8x128xf32>
    %c0_5 = arith.constant 0 : index
    %c0_6 = arith.constant 0 : index
    %7 = vector.load %arg6[%c0_5, %c0_6] : memref<8x128xf32, #tpu.memory_space<vmem>>, vector<8x128xf32>
    tpu.vector_store %arg6[%c0_5, %c0_6], %6 {strides = array<i32>} : memref<8x128xf32, #tpu.memory_space<vmem>>, vector<8x128xf32>,
    %c0_i32 = arith.constant 0 : i32
    %c0_7 = arith.constant 0 : index
    %c0_8 = arith.constant 0 : index
    %8 = vector.load %arg6[%c0_7, %c0_8] : memref<8x128xf32, #tpu.memory_space<vmem>>, vector<8x128xf32>
    %9 = arith.index_cast %c0_i32 : i32 to index
    %c0_9 = arith.constant 0 : index
    %c0_10 = arith.constant 0 : index
    %10 = vector.load %arg3[%9, %c0_9, %c0_10] : memref<2x128x128xf32, #tpu.memory_space<vmem>>, vector<1x128x128xf32>
    %11 = vector.shape_cast %10 : vector<1x128x128xf32> to vector<128x128xf32>
    %cst_11 = arith.constant dense<0.000000e+00> : vector<8x128xf32>
    %12 = tpu.matmul %8, %11, %cst_11 {dimension_numbers = #tpu.dot_dimension_numbers<[1], [0], [0], [1], [0, 0, 1, 1], [], []>} : vector<8x128xf32>, vector<128x128xf32>, vector<8x128xf32> -> vector<8x128xf32>
    %cst_12 = arith.constant 0.000000e+00 : f32
    %13 = vector.broadcast %cst_12 : f32 to vector<8x128xf32>
    %14 = arith.maximumf %12, %13 : vector<8x128xf32>
    %cst_13 = arith.constant 1.41421354 : f32
    %15 = vector.broadcast %cst_13 : f32 to vector<8x128xf32>
    %16 = arith.mulf %14, %15 : vector<8x128xf32>
    %c0_14 = arith.constant 0 : index
    %c0_15 = arith.constant 0 : index
    %17 = vector.load %arg6[%c0_14, %c0_15] : memref<8x128xf32, #tpu.memory_space<vmem>>, vector<8x128xf32>
    tpu.vector_store %arg6[%c0_14, %c0_15], %16 {strides = array<i32>} : memref<8x128xf32, #tpu.memory_space<vmem>>, vector<8x128xf32>,
    %c1_i32 = arith.constant 1 : i32
    %c0_16 = arith.constant 0 : index
    %c0_17 = arith.constant 0 : index
    %18 = vector.load %arg6[%c0_16, %c0_17] : memref<8x128xf32, #tpu.memory_space<vmem>>, vector<8x128xf32>
    %19 = arith.index_cast %c1_i32 : i32 to index
    %c0_18 = arith.constant 0 : index
    %c0_19 = arith.constant 0 : index
    %20 = vector.load %arg3[%19, %c0_18, %c0_19] : memref<2x128x128xf32, #tpu.memory_space<vmem>>, vector<1x128x128xf32>
    %21 = vector.shape_cast %20 : vector<1x128x128xf32> to vector<128x128xf32>
    %cst_20 = arith.constant dense<0.000000e+00> : vector<8x128xf32>
    %22 = tpu.matmul %18, %21, %cst_20 {dimension_numbers = #tpu.dot_dimension_numbers<[1], [0], [0], [1], [0, 0, 1, 1], [], []>} : vector<8x128xf32>, vector<128x128xf32>, vector<8x128xf32> -> vector<8x128xf32>
    %cst_21 = arith.constant 0.000000e+00 : f32
    %23 = vector.broadcast %cst_21 : f32 to vector<8x128xf32>
    %24 = arith.maximumf %22, %23 : vector<8x128xf32>
    %cst_22 = arith.constant 1.41421354 : f32
    %25 = vector.broadcast %cst_22 : f32 to vector<8x128xf32>
    %26 = arith.mulf %24, %25 : vector<8x128xf32>
    %c0_23 = arith.constant 0 : index
    %c0_24 = arith.constant 0 : index
    %27 = vector.load %arg6[%c0_23, %c0_24] : memref<8x128xf32, #tpu.memory_space<vmem>>, vector<8x128xf32>
    tpu.vector_store %arg6[%c0_23, %c0_24], %26 {strides = array<i32>} : memref<8x128xf32, #tpu.memory_space<vmem>>, vector<8x128xf32>,
    %c2_i32 = arith.constant 2 : i32
    %c0_25 = arith.constant 0 : index
    %c0_26 = arith.constant 0 : index
    %28 = vector.load %arg6[%c0_25, %c0_26] : memref<8x128xf32, #tpu.memory_space<vmem>>, vector<8x128xf32>
    %c0_27 = arith.constant 0 : index
    %c0_28 = arith.constant 0 : index
    %29 = vector.load %arg4[%c0_27, %c0_28] : memref<128x128xf32, #tpu.memory_space<vmem>>, vector<128x128xf32>
    %cst_29 = arith.constant dense<0.000000e+00> : vector<8x128xf32>
    %30 = tpu.matmul %28, %29, %cst_29 {dimension_numbers = #tpu.dot_dimension_numbers<[1], [0], [0], [1], [0, 0, 1, 1], [], []>} : vector<8x128xf32>, vector<128x128xf32>, vector<8x128xf32> -> vector<8x128xf32>
    %c0_30 = arith.constant 0 : index
    %c0_31 = arith.constant 0 : index
    %31 = vector.load %arg5[%c0_30, %c0_31] : memref<8x128xf32, #tpu.memory_space<vmem>>, vector<8x128xf32>
    tpu.vector_store %arg5[%c0_30, %c0_31], %30 {strides = array<i32>} : memref<8x128xf32, #tpu.memory_space<vmem>>, vector<8x128xf32>,
    return
  }
  func.func @transform_0(%arg0: i32) -> (i32, i32) {
    %c0_i32 = arith.constant 0 : i32
    %c0_i32_0 = arith.constant 0 : i32
    return %arg0, %c0_i32 : i32, i32
  }
  func.func @transform_1(%arg0: i32) -> (i32, i32) {
    %c0_i32 = arith.constant 0 : i32
    %c0_i32_0 = arith.constant 0 : i32
    %c0_i32_1 = arith.constant 0 : i32
    return %c0_i32, %c0_i32_0 : i32, i32
  }
  func.func @transform_2(%arg0: i32) -> (i32, i32, i32) {
    %c0_i32 = arith.constant 0 : i32
    %c0_i32_0 = arith.constant 0 : i32
    %c0_i32_1 = arith.constant 0 : i32
    %c0_i32_2 = arith.constant 0 : i32
    return %c0_i32, %c0_i32_0, %c0_i32_1 : i32, i32, i32
  }
  func.func @transform_3(%arg0: i32) -> (i32, i32) {
    %c0_i32 = arith.constant 0 : i32
    %c0_i32_0 = arith.constant 0 : i32
    %c0_i32_1 = arith.constant 0 : i32
    return %c0_i32, %c0_i32_0 : i32, i32
  }
  func.func @transform_4(%arg0: i32) -> (i32, i32) {
    %c0_i32 = arith.constant 0 : i32
    %c0_i32_0 = arith.constant 0 : i32
    return %arg0, %c0_i32 : i32, i32
  }
}

</mosaic_0001>

<bundles_post_ra>
// kernel: simplenet_forward.1
= control target key start
LH: loop header
LB: loop body
LE: loop exit
PB: predicated region body
PF: predicated region fallthrough
CT: control target
= control target key end

     0   :  { %vm1217_vm0 = vmmov 0   ;;  %s1788_s1 = inlined_call_operand.vmem [shape: f32[896,128], index: 1, kind: input, shape index: {}]   ;;  %s1789_s0 = inlined_call_operand.vmem [shape: f32[8,896], index: 0, kind: input, shape index: {}]   ;;  %s1790_s2 = inlined_call_operand.vmem [shape: f32[2,128,128], index: 2, kind: input, shape index: {}]   ;;  %s1791_s3 = inlined_call_operand.vmem [shape: f32[128,128], index: 3, kind: input, shape index: {}]   ;;  %s1792_s4 = inlined_call_operand.vmem [shape: f32[8,128], index: 4, kind: output, shape index: {}]  }
   0x1   :  { %v40_v0 = vld [vmem:[%s1788_s1 + $0x80] sm:$0xff]  ;;  %v41_v1 = vld [vmem:[%s1788_s1 + $0x88] sm:$0xff]  ;;  %v42_v11 = vld [vmem:[%s1788_s1 + $0x90] sm:$0xff] }
   0x2   :  { %v72_v2 = vld [vmem:[%s1788_s1 + $0x180] sm:$0xff]  ;;  %v1021_v3 = vpack.c.bf16 %v41_v1, %v40_v0  ;;  %v73_v4 = vld [vmem:[%s1788_s1 + $0x188] sm:$0xff]  ;;  %v43_v13 = vld [vmem:[%s1788_s1 + $0x98] sm:$0xff] }
   0x3   :  { %v24_v5 = vld [vmem:[%s1788_s1] sm:$0xff]  ;;  %v25_v6 = vld [vmem:[%s1788_s1 + $0x8] sm:$0xff]  ;;  %v1053_v7 = vpack.c.bf16 %v73_v4, %v72_v2  ;;  %v74_v14 = vld [vmem:[%s1788_s1 + $0x190] sm:$0xff]  ;;  %v1025_v16 = vpack.c.bf16 %v43_v13, %v42_v11 }
   0x4   :  { %v1023_v8 = vpack.c.bf16 %v25_v6, %v24_v5  ;;  %v56_v9 = vld [vmem:[%s1788_s1 + $0x100] sm:$0xff]  ;;  %v57_v10 = vld [vmem:[%s1788_s1 + $0x108] sm:$0xff]  ;;  %1022 = vmatprep.subr.bf16.mxu0 %v1021_v3  ;;  %v75_v15 = vld [vmem:[%s1788_s1 + $0x198] sm:$0xff] }
   0x5   :  { %v1055_v12 = vpack.c.bf16 %v57_v10, %v56_v9  ;;  %1054 = vmatprep.subr.bf16.mxu1 %v1053_v7  ;;  %v1057_v17 = vpack.c.bf16 %v75_v15, %v74_v14  ;;  %v26_v18 = vld [vmem:[%s1788_s1 + $0x10] sm:$0xff]  ;;  %v27_v19 = vld [vmem:[%s1788_s1 + $0x18] sm:$0xff]  ;;  %v44_v23 = vld [vmem:[%s1788_s1 + $0xa0] sm:$0xff] }
   0x6   :  { %1024 = vmatpush3.bf16.msra.mxu0 %v1023_v8  ;;  %v58_v20 = vld [vmem:[%s1788_s1 + $0x110] sm:$0xff]  ;;  %v1027_v21 = vpack.c.bf16 %v27_v19, %v26_v18  ;;  %v59_v22 = vld [vmem:[%s1788_s1 + $0x118] sm:$0xff]  ;;  %v45_v24 = vld [vmem:[%s1788_s1 + $0xa8] sm:$0xff] }
   0x7   :  { %1056 = vmatpush3.bf16.msra.mxu1 %v1055_v12  ;;  %1026 = vmatprep.subr.bf16.mxu0 %v1025_v16  ;;  %v1059_v25 = vpack.c.bf16 %v59_v22, %v58_v20  ;;  %v1029_v26 = vpack.c.bf16 %v45_v24, %v44_v23  ;;  %v76_v27 = vld [vmem:[%s1788_s1 + $0x1a0] sm:$0xff]  ;;  %v77_v28 = vld [vmem:[%s1788_s1 + $0x1a8] sm:$0xff]  ;;  %v46_v35 = vld [vmem:[%s1788_s1 + $0xb0] sm:$0xff] }
   0x8   :  { %1058 = vmatprep.subr.bf16.mxu1 %v1057_v17  ;;  %v28_v29 = vld [vmem:[%s1788_s1 + $0x20] sm:$0xff]  ;;  %v1061_v30 = vpack.c.bf16 %v77_v28, %v76_v27  ;;  %v29_v31 = vld [vmem:[%s1788_s1 + $0x28] sm:$0xff]  ;;  %v47_v36 = vld [vmem:[%s1788_s1 + $0xb8] sm:$0xff] }
   0x9   :  { %v60_v32 = vld [vmem:[%s1788_s1 + $0x120] sm:$0xff]  ;;  %v61_v33 = vld [vmem:[%s1788_s1 + $0x128] sm:$0xff]  ;;  %v1031_v34 = vpack.c.bf16 %v29_v31, %v28_v29  ;;  %v78_v37 = vld [vmem:[%s1788_s1 + $0x1b0] sm:$0xff]  ;;  %v1033_v39 = vpack.c.bf16 %v47_v36, %v46_v35 }
   0xa   :  { %1028 = vmatpush3.bf16.msra.mxu0 %v1027_v21  ;;  %v1063_v38 = vpack.c.bf16 %v61_v33, %v60_v32  ;;  %v79_v40 = vld [vmem:[%s1788_s1 + $0x1b8] sm:$0xff]  ;;  %v30_v41 = vld [vmem:[%s1788_s1 + $0x30] sm:$0xff]  ;;  %v48_v46 = vld [vmem:[%s1788_s1 + $0xc0] sm:$0xff] }
   0xb   :  { %1060 = vmatpush3.bf16.msra.mxu1 %v1059_v25  ;;  %1030 = vmatprep.subr.bf16.mxu0 %v1029_v26  ;;  %v31_v42 = vld [vmem:[%s1788_s1 + $0x38] sm:$0xff]  ;;  %v1065_v43 = vpack.c.bf16 %v79_v40, %v78_v37  ;;  %v62_v44 = vld [vmem:[%s1788_s1 + $0x130] sm:$0xff]  ;;  %v49_v47 = vld [vmem:[%s1788_s1 + $0xc8] sm:$0xff] }
   0xc   :  { %1062 = vmatprep.subr.bf16.mxu1 %v1061_v30  ;;  %v63_v45 = vld [vmem:[%s1788_s1 + $0x138] sm:$0xff]  ;;  %v80_v48 = vld [vmem:[%s1788_s1 + $0x1c0] sm:$0xff]  ;;  %v81_v49 = vld [vmem:[%s1788_s1 + $0x1c8] sm:$0xff]  ;;  %v1035_v50 = vpack.c.bf16 %v31_v42, %v30_v41  ;;  %v1037_v52 = vpack.c.bf16 %v49_v47, %v48_v46 }
   0xd   :  { %v1067_v51 = vpack.c.bf16 %v63_v45, %v62_v44  ;;  %v32_v53 = vld [vmem:[%s1788_s1 + $0x40] sm:$0xff]  ;;  %v33_v54 = vld [vmem:[%s1788_s1 + $0x48] sm:$0xff]  ;;  %v1069_v56 = vpack.c.bf16 %v81_v49, %v80_v48  ;;  %v50_v58 = vld [vmem:[%s1788_s1 + $0xd0] sm:$0xff] }
   0xe   :  { %1032 = vmatpush3.bf16.msra.mxu0 %v1031_v34  ;;  %v64_v55 = vld [vmem:[%s1788_s1 + $0x140] sm:$0xff]  ;;  %v65_v57 = vld [vmem:[%s1788_s1 + $0x148] sm:$0xff]  ;;  %v51_v59 = vld [vmem:[%s1788_s1 + $0xd8] sm:$0xff]  ;;  %v1039_v62 = vpack.c.bf16 %v33_v54, %v32_v53 }
   0xf   :  { %1064 = vmatpush3.bf16.msra.mxu1 %v1063_v38  ;;  %1034 = vmatprep.subr.bf16.mxu0 %v1033_v39  ;;  %v82_v60 = vld [vmem:[%s1788_s1 + $0x1d0] sm:$0xff]  ;;  %v83_v61 = vld [vmem:[%s1788_s1 + $0x1d8] sm:$0xff]  ;;  %v1071_v63 = vpack.c.bf16 %v65_v57, %v64_v55  ;;  %v1041_v0 = vpack.c.bf16 %v51_v59, %v50_v58  ;;  %v52_v6 = vld [vmem:[%s1788_s1 + $0xe0] sm:$0xff] }
  0x10   :  { %1066 = vmatprep.subr.bf16.mxu1 %v1065_v43  ;;  %v34_v1 = vld [vmem:[%s1788_s1 + $0x50] sm:$0xff]  ;;  %v35_v2 = vld [vmem:[%s1788_s1 + $0x58] sm:$0xff]  ;;  %v1073_v4 = vpack.c.bf16 %v83_v61, %v82_v60  ;;  %v53_v7 = vld [vmem:[%s1788_s1 + $0xe8] sm:$0xff] }
  0x11   :  { %v66_v3 = vld [vmem:[%s1788_s1 + $0x150] sm:$0xff]  ;;  %v67_v5 = vld [vmem:[%s1788_s1 + $0x158] sm:$0xff]  ;;  %v84_v8 = vld [vmem:[%s1788_s1 + $0x1e0] sm:$0xff]  ;;  %v1043_v10 = vpack.c.bf16 %v35_v2, %v34_v1  ;;  %v1045_v14 = vpack.c.bf16 %v53_v7, %v52_v6  ;;  %v1218_v1 = vmov 0.0  }
  0x12   :  { %1036 = vmatpush3.bf16.msra.mxu0 %v1035_v50  ;;  %v85_v9 = vld [vmem:[%s1788_s1 + $0x1e8] sm:$0xff]  ;;  %v36_v11 = vld [vmem:[%s1788_s1 + $0x60] sm:$0xff]  ;;  %v1075_v13 = vpack.c.bf16 %v67_v5, %v66_v3  ;;  %v20_v17 = vld [vmem:[%s1789_s0 + $0x18] sm:$0xff] }
  0x13   :  { %1068 = vmatpush3.bf16.msra.mxu1 %v1067_v51  ;;  %1038 = vmatprep.subr.bf16.mxu0 %v1037_v52  ;;  %v37_v12 = vld [vmem:[%s1788_s1 + $0x68] sm:$0xff]  ;;  %v68_v15 = vld [vmem:[%s1788_s1 + $0x160] sm:$0xff]  ;;  %v1077_v18 = vpack.c.bf16 %v85_v9, %v84_v8  ;;  %v54_v20 = vld [vmem:[%s1788_s1 + $0xf0] sm:$0xff]  ;;  %v1216_v51 = vmov 0.0|0.0  }
  0x14   :  { %1070 = vmatprep.subr.bf16.mxu1 %v1069_v56  ;;  %v18_v16 = vld [vmem:[%s1789_s0 + $0x8] sm:$0xff]  ;;  %v55_v21 = vld [vmem:[%s1788_s1 + $0xf8] sm:$0xff]  ;;  %v86_v22 = vld [vmem:[%s1788_s1 + $0x1f0] sm:$0xff]  ;;  %270 = vmatprep.mubr.f32.mxu1 %v20_v17  ;;  %v1047_v24 = vpack.c.bf16 %v37_v12, %v36_v11 }
  0x15   :  { %v69_v19 = vld [vmem:[%s1788_s1 + $0x168] sm:$0xff]  ;;  %200 = vmatprep.mubr.f32.mxu0 %v18_v16  ;;  %v87_v23 = vld [vmem:[%s1788_s1 + $0x1f8] sm:$0xff]  ;;  %v1049_v26 = vpack.c.bf16 %v55_v21, %v54_v20  ;;  %v38_v27 = vld [vmem:[%s1788_s1 + $0x70] sm:$0xff] }
  0x16   :  { %1040 = vmatpush3.bf16.msra.mxu0 %v1039_v62  ;;  %v1079_v25 = vpack.c.bf16 %v69_v19, %v68_v15  ;;  %v39_v28 = vld [vmem:[%s1788_s1 + $0x78] sm:$0xff]  ;;  %v70_v29 = vld [vmem:[%s1788_s1 + $0x170] sm:$0xff]  ;;  %v1081_v30 = vpack.c.bf16 %v87_v23, %v86_v22  ;;  %v104_v32 = vld [vmem:[%s1788_s1 + $0x280] sm:$0xff] }
  0x17   :  { %1072 = vmatpush3.bf16.msra.mxu1 %v1071_v63  ;;  %1042 = vmatprep.subr.bf16.mxu0 %v1041_v0  ;;  %v71_v31 = vld [vmem:[%s1788_s1 + $0x178] sm:$0xff]  ;;  %v105_v33 = vld [vmem:[%s1788_s1 + $0x288] sm:$0xff]  ;;  %v1051_v34 = vpack.c.bf16 %v39_v28, %v38_v27  ;;  %v88_v37 = vld [vmem:[%s1788_s1 + $0x200] sm:$0xff] }
  0x18   :  { %1074 = vmatprep.subr.bf16.mxu1 %v1073_v4  ;;  %v1083_v35 = vpack.c.bf16 %v71_v31, %v70_v29  ;;  %v1085_v36 = vpack.c.bf16 %v105_v33, %v104_v32  ;;  %v89_v38 = vld [vmem:[%s1788_s1 + $0x208] sm:$0xff]  ;;  %v106_v39 = vld [vmem:[%s1788_s1 + $0x290] sm:$0xff]  ;;  %v107_v40 = vld [vmem:[%s1788_s1 + $0x298] sm:$0xff] }
  0x19   :  { %v120_v41 = vld [vmem:[%s1788_s1 + $0x300] sm:$0xff]  ;;  %v121_v42 = vld [vmem:[%s1788_s1 + $0x308] sm:$0xff]  ;;  %v19_v44 = vld [vmem:[%s1789_s0 + $0x10] sm:$0xff]  ;;  %v1087_v45 = vpack.c.bf16 %v89_v38, %v88_v37  ;;  %v1089_v46 = vpack.c.bf16 %v107_v40, %v106_v39 }
  0x1a   :  { %1044 = vmatpush3.bf16.msra.mxu0 %v1043_v10  ;;  %v17_v43 = vld [vmem:[%s1789_s0] sm:$0xff]  ;;  %v90_v47 = vld [vmem:[%s1788_s1 + $0x210] sm:$0xff]  ;;  %v91_v48 = vld [vmem:[%s1788_s1 + $0x218] sm:$0xff]  ;;  %v1118_v49 = vpack.c.bf16 %v121_v42, %v120_v41 }
  0x1b   :  { %1076 = vmatpush3.bf16.msra.mxu1 %v1075_v13  ;;  %1046 = vmatprep.subr.bf16.mxu0 %v1045_v14  ;;  %v108_v50 = vld [vmem:[%s1788_s1 + $0x2a0] sm:$0xff]  ;;  %v109_v52 = vld [vmem:[%s1788_s1 + $0x2a8] sm:$0xff]  ;;  %v122_v53 = vld [vmem:[%s1788_s1 + $0x310] sm:$0xff]  ;;  %v1091_v55 = vpack.c.bf16 %v91_v48, %v90_v47 }
  0x1c   :  { %1078 = vmatprep.subr.bf16.mxu1 %v1077_v18  ;;  %v123_v54 = vld [vmem:[%s1788_s1 + $0x318] sm:$0xff]  ;;  %v92_v56 = vld [vmem:[%s1788_s1 + $0x220] sm:$0xff]  ;;  %v1093_v57 = vpack.c.bf16 %v109_v52, %v108_v50  ;;  %v93_v58 = vld [vmem:[%s1788_s1 + $0x228] sm:$0xff] }
  0x1d   :  { %v1121_v59 = vpack.c.bf16 %v123_v54, %v122_v53  ;;  %v110_v60 = vld [vmem:[%s1788_s1 + $0x2b0] sm:$0xff]  ;;  %v111_v61 = vld [vmem:[%s1788_s1 + $0x2b8] sm:$0xff]  ;;  %v124_v62 = vld [vmem:[%s1788_s1 + $0x320] sm:$0xff]  ;;  %v1095_v2 = vpack.c.bf16 %v93_v58, %v92_v56 }
  0x1e   :  { %1048 = vmatpush3.bf16.msra.mxu0 %v1047_v24  ;;  %v125_v63 = vld [vmem:[%s1788_s1 + $0x328] sm:$0xff]  ;;  %v1097_v3 = vpack.c.bf16 %v111_v61, %v110_v60  ;;  %v94_v4 = vld [vmem:[%s1788_s1 + $0x230] sm:$0xff]  ;;  %v95_v5 = vld [vmem:[%s1788_s1 + $0x238] sm:$0xff] }
  0x1f   :  { %1080 = vmatpush3.bf16.msra.mxu1 %v1079_v25  ;;  %1050 = vmatprep.subr.bf16.mxu0 %v1049_v26  ;;  %v22_v0 = vld [vmem:[%s1789_s0 + $0x28] sm:$0xff]  ;;  %v1124_v6 = vpack.c.bf16 %v125_v63, %v124_v62  ;;  %v112_v7 = vld [vmem:[%s1788_s1 + $0x2c0] sm:$0xff]  ;;  %v126_v9 = vld [vmem:[%s1788_s1 + $0x330] sm:$0xff]  ;;  %v1099_v11 = vpack.c.bf16 %v95_v5, %v94_v4 }
  0x20   :  { %1082 = vmatprep.subr.bf16.mxu1 %v1081_v30  ;;  %v113_v8 = vld [vmem:[%s1788_s1 + $0x2c8] sm:$0xff]  ;;  %v127_v10 = vld [vmem:[%s1788_s1 + $0x338] sm:$0xff]  ;;  %v96_v13 = vld [vmem:[%s1788_s1 + $0x240] sm:$0xff] }
  0x21   :  { %v1101_v12 = vpack.c.bf16 %v113_v8, %v112_v7  ;;  %v97_v14 = vld [vmem:[%s1788_s1 + $0x248] sm:$0xff]  ;;  %v1127_v15 = vpack.c.bf16 %v127_v10, %v126_v9  ;;  %v114_v16 = vld [vmem:[%s1788_s1 + $0x2d0] sm:$0xff]  ;;  %v115_v17 = vld [vmem:[%s1788_s1 + $0x2d8] sm:$0xff] }
  0x22   :  { %1052 = vmatpush3.bf16.msra.mxu0 %v1051_v34  ;;  %v128_v18 = vld [vmem:[%s1788_s1 + $0x340] sm:$0xff]  ;;  %v129_v19 = vld [vmem:[%s1788_s1 + $0x348] sm:$0xff]  ;;  %v1103_v20 = vpack.c.bf16 %v97_v14, %v96_v13  ;;  %v1105_v21 = vpack.c.bf16 %v115_v17, %v114_v16  ;;  %v98_v22 = vld [vmem:[%s1788_s1 + $0x250] sm:$0xff] }
  0x23   :  { %1084 = vmatpush3.bf16.msra.mxu1 %v1083_v35  ;;  %1086 = vmatprep.subr.bf16.mxu0 %v1085_v36  ;;  %v99_v23 = vld [vmem:[%s1788_s1 + $0x258] sm:$0xff]  ;;  %v1130_v24 = vpack.c.bf16 %v129_v19, %v128_v18  ;;  %v116_v25 = vld [vmem:[%s1788_s1 + $0x2e0] sm:$0xff]  ;;  %v117_v26 = vld [vmem:[%s1788_s1 + $0x2e8] sm:$0xff] }
  0x24   :  { %1117 = vmatprep.subr.bf16.mxu1 %v1216_v51  ;;  %v130_v27 = vld [vmem:[%s1788_s1 + $0x350] sm:$0xff]  ;;  %v131_v28 = vld [vmem:[%s1788_s1 + $0x358] sm:$0xff]  ;;  %v1107_v29 = vpack.c.bf16 %v99_v23, %v98_v22  ;;  %v1109_v30 = vpack.c.bf16 %v117_v26, %v116_v25  ;;  %v100_v31 = vld [vmem:[%s1788_s1 + $0x260] sm:$0xff] }
  0x25   :  { %201 = vmatmul.mubr.f32.vlgmr.msra.gmra.mrb[0].mxu0 %v17_v43  ;;  %v101_v32 = vld [vmem:[%s1788_s1 + $0x268] sm:$0xff]  ;;  %v1133_v33 = vpack.c.bf16 %v131_v28, %v130_v27  ;;  %v118_v34 = vld [vmem:[%s1788_s1 + $0x2f0] sm:$0xff]  ;;  %v119_v35 = vld [vmem:[%s1788_s1 + $0x2f8] sm:$0xff] }
  0x26   :  { %271 = vmatmul.mubr.f32.vlgmr.msra.gmra.mrb[0].mxu1 %v19_v44  ;;  %1088 = vmatpush3.bf16.msra.mxu0 %v1087_v45  ;;  %v132_v36 = vld [vmem:[%s1788_s1 + $0x360] sm:$0xff]  ;;  %v133_v37 = vld [vmem:[%s1788_s1 + $0x368] sm:$0xff]  ;;  %v1111_v38 = vpack.c.bf16 %v101_v32, %v100_v31  ;;  %v1113_v39 = vpack.c.bf16 %v119_v35, %v118_v34  ;;  %v102_v40 = vld [vmem:[%s1788_s1 + $0x270] sm:$0xff] }
  0x27   :  { %1090 = vmatprep.subr.bf16.mxu0 %v1089_v46  ;;  %1119 = vmatpush3.bf16.msra.mxu1 %v1118_v49  ;;  %v103_v41 = vld [vmem:[%s1788_s1 + $0x278] sm:$0xff]  ;;  %v1136_v42 = vpack.c.bf16 %v133_v37, %v132_v36  ;;  %v134_v43 = vld [vmem:[%s1788_s1 + $0x370] sm:$0xff]  ;;  %v21_v47 = vld [vmem:[%s1789_s0 + $0x20] sm:$0xff] }
  0x28   :  { %1120 = vmatprep.subr.bf16.mxu1 %v1216_v51  ;;  %913 = vmatprep.mubr.msk.f32.mxu1 %vm1217_vm0, %v1218_v1  ;;  %v135_v44 = vld [vmem:[%s1788_s1 + $0x378] sm:$0xff]  ;;  %v1115_v45 = vpack.c.bf16 %v103_v41, %v102_v40  ;;  %v23_v48 = vld [vmem:[%s1789_s0 + $0x30] sm:$0xff]  ;;  %v420_v49 = vld [vmem:[%s1790_s2] sm:$0xff] }
  0x29   :  { %340 = vmatprep.mubr.f32.mxu0 %v22_v0  ;;  %v1139_v46 = vpack.c.bf16 %v135_v44, %v134_v43  ;;  %v421_v50 = vld [vmem:[%s1790_s2 + $0x8] sm:$0xff]  ;;  %v422_v52 = vld [vmem:[%s1790_s2 + $0x10] sm:$0xff]  ;;  %v423_v54 = vld [vmem:[%s1790_s2 + $0x18] sm:$0xff] }
  0x2a   :  { %1092 = vmatpush3.bf16.msra.mxu0 %v1091_v55  ;;  %v1142_v53 = vpack.c.bf16 %v421_v50, %v420_v49  ;;  %v1145_v55 = vpack.c.bf16 %v423_v54, %v422_v52  ;;  %v424_v56 = vld [vmem:[%s1790_s2 + $0x20] sm:$0xff]  ;;  %v427_v60 = vld [vmem:[%s1790_s2 + $0x38] sm:$0xff]  ;;  %v429_v63 = vld [vmem:[%s1790_s2 + $0x48] sm:$0xff] }
  0x2b   :  { %1094 = vmatprep.subr.bf16.mxu0 %v1093_v57  ;;  %1122 = vmatpush3.bf16.msra.mxu1 %v1121_v59  ;;  %v425_v57 = vld [vmem:[%s1790_s2 + $0x28] sm:$0xff]  ;;  %v426_v59 = vld [vmem:[%s1790_s2 + $0x30] sm:$0xff]  ;;  %v428_v62 = vld [vmem:[%s1790_s2 + $0x40] sm:$0xff] }
  0x2c   :  { %1123 = vmatprep.subr.bf16.mxu1 %v1216_v51  ;;  %v1148_v58 = vpack.c.bf16 %v425_v57, %v424_v56  ;;  %v1151_v61 = vpack.c.bf16 %v427_v60, %v426_v59  ;;  %v1154_v0 = vpack.c.bf16 %v429_v63, %v428_v62  ;;  %v432_v5 = vld [vmem:[%s1790_s2 + $0x60] sm:$0xff]  ;;  %v434_v8 = vld [vmem:[%s1790_s2 + $0x70] sm:$0xff]  ;;  %v435_v9 = vld [vmem:[%s1790_s2 + $0x78] sm:$0xff] }
  0x2d   :  { %v1163_v10 = vpack.c.bf16 %v435_v9, %v434_v8  ;;  %v694_v13 = vld [vmem:[%s1790_s2 + $0x90] sm:$0xff]  ;;  %v696_v17 = vld [vmem:[%s1790_s2 + $0xa0] sm:$0xff]  ;;  %v697_v18 = vld [vmem:[%s1790_s2 + $0xa8] sm:$0xff] }
  0x2e   :  { %1096 = vmatpush3.bf16.msra.mxu0 %v1095_v2  ;;  %v430_v2 = vld [vmem:[%s1790_s2 + $0x50] sm:$0xff]  ;;  %v1172_v19 = vpack.c.bf16 %v697_v18, %v696_v17  ;;  %v700_v23 = vld [vmem:[%s1790_s2 + $0xc0] sm:$0xff]  ;;  %v703_v27 = vld [vmem:[%s1790_s2 + $0xd8] sm:$0xff] }
  0x2f   :  { %1098 = vmatprep.subr.bf16.mxu0 %v1097_v3  ;;  %1125 = vmatpush3.bf16.msra.mxu1 %v1124_v6  ;;  %v431_v3 = vld [vmem:[%s1790_s2 + $0x58] sm:$0xff]  ;;  %v433_v6 = vld [vmem:[%s1790_s2 + $0x68] sm:$0xff]  ;;  %v702_v26 = vld [vmem:[%s1790_s2 + $0xd0] sm:$0xff] }
  0x30   :  { %1126 = vmatprep.subr.bf16.mxu1 %v1216_v51  ;;  %v1157_v4 = vpack.c.bf16 %v431_v3, %v430_v2  ;;  %v1160_v7 = vpack.c.bf16 %v433_v6, %v432_v5  ;;  %v1181_v28 = vpack.c.bf16 %v703_v27, %v702_v26  ;;  %v707_v49 = vld [vmem:[%s1790_s2 + $0xf8] sm:$0xff]  ;;  %v601_v52 = vld [vmem:[%s1791_s3] sm:$0xff]  ;;  %v607_v60 = vld [vmem:[%s1791_s3 + $0x30] sm:$0xff] }
  0x31   :  { %v605_v57 = vld [vmem:[%s1791_s3 + $0x20] sm:$0xff]  ;;  %v611_v3 = vld [vmem:[%s1791_s3 + $0x50] sm:$0xff] }
  0x32   :  { %1100 = vmatpush3.bf16.msra.mxu0 %v1099_v11  ;;  %v692_v11 = vld [vmem:[%s1790_s2 + $0x80] sm:$0xff] }
  0x33   :  { %1102 = vmatprep.subr.bf16.mxu0 %v1101_v12  ;;  %1128 = vmatpush3.bf16.msra.mxu1 %v1127_v15  ;;  %v693_v12 = vld [vmem:[%s1790_s2 + $0x88] sm:$0xff]  ;;  %v695_v15 = vld [vmem:[%s1790_s2 + $0x98] sm:$0xff]  ;;  %v609_v63 = vld [vmem:[%s1791_s3 + $0x40] sm:$0xff] }
  0x34   :  { %1129 = vmatprep.subr.bf16.mxu1 %v1216_v51  ;;  %v1166_v14 = vpack.c.bf16 %v693_v12, %v692_v11  ;;  %v1169_v16 = vpack.c.bf16 %v695_v15, %v694_v13  ;;  %v613_v6 = vld [vmem:[%s1791_s3 + $0x60] sm:$0xff]  ;;  %v615_v13 = vld [vmem:[%s1791_s3 + $0x70] sm:$0xff] }
  0x36   :  { %1104 = vmatpush3.bf16.msra.mxu0 %v1103_v20  ;;  %v698_v20 = vld [vmem:[%s1790_s2 + $0xb0] sm:$0xff] }
  0x37   :  { %1106 = vmatprep.subr.bf16.mxu0 %v1105_v21  ;;  %1131 = vmatpush3.bf16.msra.mxu1 %v1130_v24  ;;  %v699_v21 = vld [vmem:[%s1790_s2 + $0xb8] sm:$0xff]  ;;  %v701_v24 = vld [vmem:[%s1790_s2 + $0xc8] sm:$0xff] }
  0x38   :  { %1132 = vmatprep.subr.bf16.mxu1 %v1216_v51  ;;  %v1175_v22 = vpack.c.bf16 %v699_v21, %v698_v20  ;;  %v1178_v25 = vpack.c.bf16 %v701_v24, %v700_v23 }
  0x3a   :  { %1108 = vmatpush3.bf16.msra.mxu0 %v1107_v29  ;;  %v704_v29 = vld [vmem:[%s1790_s2 + $0xe0] sm:$0xff] }
  0x3b   :  { %1110 = vmatprep.subr.bf16.mxu0 %v1109_v30  ;;  %1134 = vmatpush3.bf16.msra.mxu1 %v1133_v33  ;;  %v705_v30 = vld [vmem:[%s1790_s2 + $0xe8] sm:$0xff] }
  0x3c   :  { %1135 = vmatprep.subr.bf16.mxu1 %v1216_v51  ;;  %v1184_v31 = vpack.c.bf16 %v705_v30, %v704_v29 }
  0x3e   :  { %1112 = vmatpush3.bf16.msra.mxu0 %v1111_v38 }
  0x3f   :  { %1114 = vmatprep.subr.bf16.mxu0 %v1113_v39  ;;  %1137 = vmatpush3.bf16.msra.mxu1 %v1136_v42 }
  0x40   :  { %1138 = vmatprep.subr.bf16.mxu1 %v1216_v51 }
  0x42   :  { %1116 = vmatpush3.bf16.msra.mxu0 %v1115_v45 }
  0x43   :  { %1140 = vmatpush3.bf16.msra.mxu1 %v1139_v46  ;;  %1141 = vmatprep.subr.bf16.mxu0 %v1216_v51 }
  0x44   :  { %1165 = vmatprep.subr.bf16.mxu1 %v1216_v51 }
  0x45   :  { %341 = vmatmul.mubr.f32.vlgmr.msra.gmra.mrb[2].mxu0 %v21_v47 }
  0x46   :  { %914 = vmatmul.mubr.f32.vlgmr.msra.gmra.mrb[2].mxu1 %v23_v48  ;;  %948 = vmatprep.mubr.msk.f32.mxu0 %vm1217_vm0, %v1218_v1  ;;  %v706_v48 = vld [vmem:[%s1790_s2 + $0xf0] sm:$0xff] }
  0x47   :  { %983 = vmatprep.mubr.msk.f32.mxu1 %vm1217_vm0, %v1218_v1  ;;  %1143 = vmatpush3.bf16.msra.mxu0 %v1142_v53  ;;  %v1187_v50 = vpack.c.bf16 %v707_v49, %v706_v48  ;;  %v602_v53 = vld [vmem:[%s1791_s3 + $0x8] sm:$0xff] }
  0x48   :  { %1144 = vmatprep.subr.bf16.mxu0 %v1216_v51  ;;  %1167 = vmatpush3.bf16.msra.mxu1 %v1166_v14  ;;  %v1190_v54 = vpack.c.bf16 %v602_v53, %v601_v52  ;;  %v616_v14 = vld [vmem:[%s1791_s3 + $0x78] sm:$0xff] }
  0x49   :  { %1168 = vmatprep.subr.bf16.mxu1 %v1216_v51  ;;  %v1211_v15 = vpack.c.bf16 %v616_v14, %v615_v13 }
  0x4b   :  { %1146 = vmatpush3.bf16.msra.mxu0 %v1145_v55  ;;  %v604_v55 = vld [vmem:[%s1791_s3 + $0x18] sm:$0xff] }
  0x4c   :  { %1147 = vmatprep.subr.bf16.mxu0 %v1216_v51  ;;  %1170 = vmatpush3.bf16.msra.mxu1 %v1169_v16 }
  0x4d   :  { %1171 = vmatprep.subr.bf16.mxu1 %v1216_v51 }
  0x4f   :  { %1149 = vmatpush3.bf16.msra.mxu0 %v1148_v58  ;;  %v606_v58 = vld [vmem:[%s1791_s3 + $0x28] sm:$0xff] }
  0x50   :  { %1150 = vmatprep.subr.bf16.mxu0 %v1216_v51  ;;  %1173 = vmatpush3.bf16.msra.mxu1 %v1172_v19  ;;  %v1196_v59 = vpack.c.bf16 %v606_v58, %v605_v57 }
  0x51   :  { %1174 = vmatprep.subr.bf16.mxu1 %v1216_v51 }
  0x53   :  { %1152 = vmatpush3.bf16.msra.mxu0 %v1151_v61  ;;  %v608_v61 = vld [vmem:[%s1791_s3 + $0x38] sm:$0xff] }
  0x54   :  { %1153 = vmatprep.subr.bf16.mxu0 %v1216_v51  ;;  %1176 = vmatpush3.bf16.msra.mxu1 %v1175_v22  ;;  %v1199_v62 = vpack.c.bf16 %v608_v61, %v607_v60 }
  0x55   :  { %1177 = vmatprep.subr.bf16.mxu1 %v1216_v51 }
  0x57   :  { %1155 = vmatpush3.bf16.msra.mxu0 %v1154_v0  ;;  %v610_v0 = vld [vmem:[%s1791_s3 + $0x48] sm:$0xff] }
  0x58   :  { %1156 = vmatprep.subr.bf16.mxu0 %v1216_v51  ;;  %1179 = vmatpush3.bf16.msra.mxu1 %v1178_v25  ;;  %v1202_v2 = vpack.c.bf16 %v610_v0, %v609_v63 }
  0x59   :  { %1180 = vmatprep.subr.bf16.mxu1 %v1216_v51 }
  0x5b   :  { %1158 = vmatpush3.bf16.msra.mxu0 %v1157_v4  ;;  %v612_v4 = vld [vmem:[%s1791_s3 + $0x58] sm:$0xff] }
  0x5c   :  { %1159 = vmatprep.subr.bf16.mxu0 %v1216_v51  ;;  %1182 = vmatpush3.bf16.msra.mxu1 %v1181_v28  ;;  %v1205_v5 = vpack.c.bf16 %v612_v4, %v611_v3 }
  0x5d   :  { %1183 = vmatprep.subr.bf16.mxu1 %v1216_v51 }
  0x5f   :  { %1161 = vmatpush3.bf16.msra.mxu0 %v1160_v7  ;;  %v614_v7 = vld [vmem:[%s1791_s3 + $0x68] sm:$0xff] }
  0x60   :  { %1162 = vmatprep.subr.bf16.mxu0 %v1216_v51  ;;  %1185 = vmatpush3.bf16.msra.mxu1 %v1184_v31  ;;  %v1208_v8 = vpack.c.bf16 %v614_v7, %v613_v6 }
  0x61   :  { %1186 = vmatprep.subr.bf16.mxu1 %v1216_v51 }
  0x63   :  { %1164 = vmatpush3.bf16.msra.mxu0 %v1163_v10 }
  0x64   :  { %1189 = vmatprep.subr.bf16.mxu0 %v1216_v51  ;;  %1188 = vmatpush3.bf16.msra.mxu1 %v1187_v50 }
  0xf8   :  { %v740_v32 = vpop.f32.mrb[0].mxu0 }
  0xf9   :  { %v775_v33 = vpop.f32.mrb[0].mxu1  ;;  %v741_v34 = vpop.f32.mrb[1].mxu0 }
  0xfa   :  { %v742_v35 = vadd.f32 %v741_v34, %v740_v32  ;;  %v776_v36 = vpop.f32.mrb[1].mxu1 }
  0xfb   :  { %v777_v37 = vadd.f32 %v776_v36, %v775_v33 }
  0xfd   :  { %v273_v38 = vadd.f32 %v777_v37, %v742_v35 }
 0x118   :  { %v810_v39 = vpop.f32.mrb[2].mxu0 }
 0x119   :  { %v811_v40 = vpop.f32.mrb[3].mxu0  ;;  %v412_v41 = vpop.f32.mrb[2].mxu1 }
 0x11a   :  { %v812_v42 = vadd.f32 %v811_v40, %v810_v39  ;;  %v915_v43 = vpop.f32.mrb[3].mxu1 }
 0x11c   :  { %v343_v44 = vadd.f32 %v812_v42, %v273_v38 }
 0x11e   :  { %v413_v45 = vadd.f32 %v412_v41, %v343_v44 }
 0x120   :  { %v416_v46 = vmax.f32 %v413_v45, 0.0 }
 0x122   :  { %v417_v47 = vmul.f32 1.4142135, %v416_v46 }
 0x124   :  { %949 = vmatmul.mubr.f32.vlgmr.msra.gmra.mrb[4].mxu0 %v417_v47 }
 0x125   :  { %1018 = vmatprep.mubr.msk.f32.mxu0 %vm1217_vm0, %v1218_v1  ;;  %v603_v1 = vld [vmem:[%s1791_s3 + $0x10] sm:$0xff]  ;;  %1191 = vmatpush3.bf16.msra.mxu0 %v1190_v54 }
 0x126   :  { %v1193_v56 = vpack.c.bf16 %v604_v55, %v603_v1  ;;  %1192 = vmatprep.subr.bf16.mxu0 %v1216_v51 }
 0x129   :  { %1194 = vmatpush3.bf16.msra.mxu0 %v1193_v56 }
 0x12a   :  { %1195 = vmatprep.subr.bf16.mxu0 %v1216_v51 }
 0x12d   :  { %1197 = vmatpush3.bf16.msra.mxu0 %v1196_v59 }
 0x12e   :  { %1198 = vmatprep.subr.bf16.mxu0 %v1216_v51 }
 0x131   :  { %1200 = vmatpush3.bf16.msra.mxu0 %v1199_v62 }
 0x132   :  { %1201 = vmatprep.subr.bf16.mxu0 %v1216_v51 }
 0x135   :  { %1203 = vmatpush3.bf16.msra.mxu0 %v1202_v2 }
 0x136   :  { %1204 = vmatprep.subr.bf16.mxu0 %v1216_v51 }
 0x139   :  { %1206 = vmatpush3.bf16.msra.mxu0 %v1205_v5 }
 0x13a   :  { %1207 = vmatprep.subr.bf16.mxu0 %v1216_v51 }
 0x13d   :  { %1209 = vmatpush3.bf16.msra.mxu0 %v1208_v8 }
 0x13e   :  { %1210 = vmatprep.subr.bf16.mxu0 %v1216_v51 }
 0x141   :  { %1212 = vmatpush3.bf16.msra.mxu0 %v1211_v15 }
 0x1f7   :  { %v502_v9 = vpop.f32.mrb[4].mxu0 }
 0x1f8   :  { %v506_v10 = vmax.f32 %v502_v9, 0.0  ;;  %v950_v11 = vpop.f32.mrb[5].mxu0 }
 0x1fa   :  { %v507_v12 = vmul.f32 1.4142135, %v506_v10 }
 0x1fc   :  { %984 = vmatmul.mubr.f32.vlgmr.msra.gmra.mrb[4].mxu1 %v507_v12 }
 0x2cf   :  { %v593_v16 = vpop.f32.mrb[4].mxu1 }
 0x2d0   :  { %v597_v17 = vmax.f32 %v593_v16, 0.0  ;;  %v985_v18 = vpop.f32.mrb[5].mxu1 }
 0x2d2   :  { %v598_v19 = vmul.f32 1.4142135, %v597_v17 }
 0x2d4   :  { %1019 = vmatmul.mubr.f32.vlgmr.msra.gmra.mrb[6].mxu0 %v598_v19 }
 0x3a7   :  { %v683_v51 = vpop.f32.mrb[6].mxu0 }
 0x3a8   :  { %687 = vst [vmem:[%s1792_s4] sm:$0xff] %v683_v51  ;;  %v1020_v20 = vpop.f32.mrb[7].mxu0 }

</bundles_post_ra>
